<compile_context>
chip_gen: v5e
topology: v5e:2x2
jax: 0.10.0
libtpu: 0.0.40
codegen_flags: <defaults>
</compile_context>

<pallas_src>
import jax
import jax.numpy as jnp
from jax.experimental import pallas as pl
from jax.experimental.pallas import tpu as pltpu


def _round_up(x, m):
    return ((x + m - 1) // m) * m


def _mlp_kernel(x_ref, w1_ref, b1_ref, w2_ref, b2_ref, o_ref):
    # Cast x to the MXU stream dtype in-kernel (no extra HBM pass in the wrapper).
    x = x_ref[...].astype(w1_ref.dtype)
    # Linear 1 on the MXU (bf16 in, f32 accumulate); bias + ReLU in f32 on the VPU.
    h = jnp.dot(x, w1_ref[...], preferred_element_type=jnp.float32)
    h = jnp.maximum(h + b1_ref[...], 0.0)                      # (tb, 256) + (1, 256)
    # Dropout: identity in eval mode.
    # TODO(synk): training-mode Dropout (pltpu.prng_seed + prng_random_bits mask) not implemented.
    # Linear 2 on the MXU; W2/b2 are lane-padded to 128 columns (zeros beyond col 2).
    out = jnp.dot(h.astype(w2_ref.dtype), w2_ref[...],
                  preferred_element_type=jnp.float32)          # (tb, 128)
    o_ref[...] = (out + b2_ref[...]).astype(o_ref.dtype)


def default_mlp_forward(x, w1, b1, w2, b2, *, tile_b=2048, use_bf16=True):
    """x: (B, D_in); w1: (D_in, 256); b1: (256,)/(1,256); w2: (256, 2); b2: (2,)/(1,2)."""
    B, D_in = x.shape
    H = w1.shape[1]
    O = w2.shape[1]
    out_dtype = x.dtype

    # MXU stream dtype; accumulation / bias / ReLU stay f32 inside the kernel.
    compute_dtype = jnp.bfloat16 if use_bf16 else jnp.float32

    # Lane-dense output slab: pad the O=2 logits dim up to a full 128-lane width.
    O_pad = max(_round_up(O, 128), 128)

    # Batch tile: 16-aligned (bf16 sublane packing), capped at the (aligned) batch,
    # and clamped so the grid has >= 2 steps when possible (keeps both v7x TCs busy).
    tile_b_eff = min(tile_b, _round_up(B, 16))
    tile_b_eff = min(tile_b_eff, max(16, _round_up(pl.cdiv(B, 2), 16)))
    tile_b_eff = max(16, tile_b_eff)

    grid = (pl.cdiv(B, tile_b_eff),)   # ragged last block handled by Pallas masking

    # Weights / biases: tiny and resident across the whole grid -> prep in the wrapper.
    w1_c = w1.astype(compute_dtype)
    w2_c = jnp.zeros((H, O_pad), compute_dtype).at[:, :O].set(w2.astype(compute_dtype))
    b1_f = jnp.asarray(b1, jnp.float32).reshape(1, H)
    b2_f = jnp.zeros((1, O_pad), jnp.float32).at[:, :O].set(
        jnp.asarray(b2, jnp.float32).reshape(1, O))

    out = pl.pallas_call(
        _mlp_kernel,
        out_shape=jax.ShapeDtypeStruct((B, O_pad), out_dtype),
        grid_spec=pl.GridSpec(
            grid=grid,
            in_specs=[
                pl.BlockSpec((tile_b_eff, D_in), lambda i: (i, 0)),  # x tile over batch
                pl.BlockSpec((D_in, H),          lambda i: (0, 0)),  # W1 (resident)
                pl.BlockSpec((1, H),             lambda i: (0, 0)),  # b1
                pl.BlockSpec((H, O_pad),         lambda i: (0, 0)),  # W2 (lane-padded)
                pl.BlockSpec((1, O_pad),         lambda i: (0, 0)),  # b2 (lane-padded)
            ],
            out_specs=pl.BlockSpec((tile_b_eff, O_pad), lambda i: (i, 0)),
        ),
        compiler_params=pltpu.CompilerParams(
            dimension_semantics=("parallel",)),
    )(x, w1_c, b1_f, w2_c, b2_f)

    # Drop the zero-padded lanes; keep only the true 2 logits.
    return out[:, :O]


if __name__ == "__main__":
    # Small shapes consistent with the module: input_shape=32, hidden=256, out=2.
    B, D_in, H, O = 16, 32, 256, 2

    key = jax.random.PRNGKey(0)
    kx, kw1, kb1, kw2, kb2 = jax.random.split(key, 5)

    x = jax.random.normal(kx, (B, D_in), dtype=jnp.float32)
    # Deterministic parameter init (Kaiming-uniform-like scale, stored as [in, out]).
    lim1 = 1.0 / jnp.sqrt(D_in)
    lim2 = 1.0 / jnp.sqrt(H)
    w1 = jax.random.uniform(kw1, (D_in, H), jnp.float32, -lim1, lim1)
    b1 = jax.random.uniform(kb1, (1, H), jnp.float32, -lim1, lim1)
    w2 = jax.random.uniform(kw2, (H, O), jnp.float32, -lim2, lim2)
    b2 = jax.random.uniform(kb2, (1, O), jnp.float32, -lim2, lim2)

    logits = default_mlp_forward(x, w1, b1, w2, b2)
    logits = jax.block_until_ready(logits)
    assert logits.shape == (B, O)

    # Reference 1: f32 math (loose tolerance: kernel streams bf16 MXU operands).
    ref_f32 = jnp.maximum(x @ w1 + b1, 0.0) @ w2 + b2
    assert jnp.allclose(logits, ref_f32, atol=5e-2, rtol=5e-2), (
        jnp.max(jnp.abs(logits - ref_f32)))

    # Reference 2: matching bf16-input / f32-accumulate math (tight tolerance).
    h_ref = jnp.maximum(
        jnp.dot(x.astype(jnp.bfloat16), w1.astype(jnp.bfloat16),
                preferred_element_type=jnp.float32) + b1, 0.0)
    ref_bf16 = jnp.dot(h_ref.astype(jnp.bfloat16), w2.astype(jnp.bfloat16),
                       preferred_element_type=jnp.float32) + b2
    assert jnp.allclose(logits, ref_bf16, atol=1e-5, rtol=1e-5), (
        jnp.max(jnp.abs(logits - ref_bf16)))

    # Ragged / multi-step grid path (B not divisible by the tile, no wrapper pad).
    x_big = jax.random.normal(kx, (1000, D_in), dtype=jnp.float32)
    logits_big = jax.block_until_ready(default_mlp_forward(x_big, w1, b1, w2, b2))
    ref_big = jnp.maximum(x_big @ w1 + b1, 0.0) @ w2 + b2
    assert logits_big.shape == (1000, O)
    assert jnp.allclose(logits_big, ref_big, atol=5e-2, rtol=5e-2)

    # f32 exact-parity path (use_bf16=False) as a correctness cross-check.
    logits_f32 = jax.block_until_ready(
        default_mlp_forward(x, w1, b1, w2, b2, use_bf16=False))
    assert jnp.allclose(logits_f32, ref_f32, atol=1e-4, rtol=1e-4)

    print("KERNEL_OK")
</pallas_src>

<mosaic_0001>
module attributes {stable_mosaic.version = 11 : i64} {
  func.func @_mlp_kernel(%arg0: i32, %arg1: memref<16x32xf32, #tpu.memory_space<vmem>>, %arg2: memref<32x256xbf16, #tpu.memory_space<vmem>>, %arg3: memref<1x256xf32, #tpu.memory_space<vmem>>, %arg4: memref<256x128xbf16, #tpu.memory_space<vmem>>, %arg5: memref<1x128xf32, #tpu.memory_space<vmem>>, %arg6: memref<16x128xf32, #tpu.memory_space<vmem>>) attributes {dimension_semantics = [#tpu.dimension_semantics<parallel>], iteration_bounds = array<i64: 1>, scalar_prefetch = 0 : i64, scratch_operands = 0 : i64, tpu.core_type = #tpu.core_type<tc>, window_params = [{transform_indices = @transform_0, window_bounds = array<i64: 16, 32>}, {pipeline_mode = #tpu.pipeline_mode<synchronous>, transform_indices = @transform_1, window_bounds = array<i64: 32, 256>}, {pipeline_mode = #tpu.pipeline_mode<synchronous>, transform_indices = @transform_2, window_bounds = array<i64: 1, 256>}, {pipeline_mode = #tpu.pipeline_mode<synchronous>, transform_indices = @transform_3, window_bounds = array<i64: 256, 128>}, {pipeline_mode = #tpu.pipeline_mode<synchronous>, transform_indices = @transform_4, window_bounds = array<i64: 1, 128>}, {transform_indices = @transform_5, window_bounds = array<i64: 16, 128>}]} {
    %c0 = arith.constant 0 : index
    %c0_0 = arith.constant 0 : index
    %0 = vector.load %arg1[%c0, %c0_0] : memref<16x32xf32, #tpu.memory_space<vmem>>, vector<16x32xf32>
    %1 = arith.truncf %0 : vector<16x32xf32> to vector<16x32xbf16>
    %c0_1 = arith.constant 0 : index
    %c0_2 = arith.constant 0 : index
    %2 = vector.load %arg2[%c0_1, %c0_2] : memref<32x256xbf16, #tpu.memory_space<vmem>>, vector<32x256xbf16>
    %cst = arith.constant dense<0.000000e+00> : vector<16x256xf32>
    %3 = tpu.matmul %1, %2, %cst {dimension_numbers = #tpu.dot_dimension_numbers<[1], [0], [0], [1], [0, 0, 1, 1], [], []>} : vector<16x32xbf16>, vector<32x256xbf16>, vector<16x256xf32> -> vector<16x256xf32>
    %c0_3 = arith.constant 0 : index
    %c0_4 = arith.constant 0 : index
    %4 = vector.load %arg3[%c0_3, %c0_4] : memref<1x256xf32, #tpu.memory_space<vmem>>, vector<1x256xf32>
    %5 = vector.broadcast %4 : vector<1x256xf32> to vector<16x256xf32>
    %6 = arith.addf %3, %5 : vector<16x256xf32>
    %cst_5 = arith.constant 0.000000e+00 : f32
    %7 = vector.broadcast %cst_5 : f32 to vector<16x256xf32>
    %8 = arith.maximumf %6, %7 : vector<16x256xf32>
    %9 = arith.truncf %8 : vector<16x256xf32> to vector<16x256xbf16>
    %c0_6 = arith.constant 0 : index
    %c0_7 = arith.constant 0 : index
    %10 = vector.load %arg4[%c0_6, %c0_7] : memref<256x128xbf16, #tpu.memory_space<vmem>>, vector<256x128xbf16>
    %cst_8 = arith.constant dense<0.000000e+00> : vector<16x128xf32>
    %11 = tpu.matmul %9, %10, %cst_8 {dimension_numbers = #tpu.dot_dimension_numbers<[1], [0], [0], [1], [0, 0, 1, 1], [], []>} : vector<16x256xbf16>, vector<256x128xbf16>, vector<16x128xf32> -> vector<16x128xf32>
    %c0_9 = arith.constant 0 : index
    %c0_10 = arith.constant 0 : index
    %12 = vector.load %arg5[%c0_9, %c0_10] : memref<1x128xf32, #tpu.memory_space<vmem>>, vector<1x128xf32>
    %13 = vector.broadcast %12 : vector<1x128xf32> to vector<16x128xf32>
    %14 = arith.addf %11, %13 : vector<16x128xf32>
    %c0_11 = arith.constant 0 : index
    %c0_12 = arith.constant 0 : index
    %15 = vector.load %arg6[%c0_11, %c0_12] : memref<16x128xf32, #tpu.memory_space<vmem>>, vector<16x128xf32>
    tpu.vector_store %arg6[%c0_11, %c0_12], %14 {strides = array<i32>} : memref<16x128xf32, #tpu.memory_space<vmem>>, vector<16x128xf32>,
    return
  }
  func.func @transform_0(%arg0: i32) -> (i32, i32) {
    %c0_i32 = arith.constant 0 : i32
    %c0_i32_0 = arith.constant 0 : i32
    return %arg0, %c0_i32 : i32, i32
  }
  func.func @transform_1(%arg0: i32) -> (i32, i32) {
    %c0_i32 = arith.constant 0 : i32
    %c0_i32_0 = arith.constant 0 : i32
    %c0_i32_1 = arith.constant 0 : i32
    return %c0_i32, %c0_i32_0 : i32, i32
  }
  func.func @transform_2(%arg0: i32) -> (i32, i32) {
    %c0_i32 = arith.constant 0 : i32
    %c0_i32_0 = arith.constant 0 : i32
    %c0_i32_1 = arith.constant 0 : i32
    return %c0_i32, %c0_i32_0 : i32, i32
  }
  func.func @transform_3(%arg0: i32) -> (i32, i32) {
    %c0_i32 = arith.constant 0 : i32
    %c0_i32_0 = arith.constant 0 : i32
    %c0_i32_1 = arith.constant 0 : i32
    return %c0_i32, %c0_i32_0 : i32, i32
  }
  func.func @transform_4(%arg0: i32) -> (i32, i32) {
    %c0_i32 = arith.constant 0 : i32
    %c0_i32_0 = arith.constant 0 : i32
    %c0_i32_1 = arith.constant 0 : i32
    return %c0_i32, %c0_i32_0 : i32, i32
  }
  func.func @transform_5(%arg0: i32) -> (i32, i32) {
    %c0_i32 = arith.constant 0 : i32
    %c0_i32_0 = arith.constant 0 : i32
    return %arg0, %c0_i32 : i32, i32
  }
}

</mosaic_0001>

<bundles_post_ra>
// kernel: tpu_custom_call.1
= control target key start
LH: loop header
LB: loop body
LE: loop exit
PB: predicated region body
PF: predicated region fallthrough
CT: control target
= control target key end

     0   :  { %10 = vsyncpa [#allocation3], 0  ;;  %s643_s0 = inlined_call_operand.hbm [shape: f32[16,32], index: 0, kind: input, shape index: {}]   ;;  %s644_s1 = inlined_call_operand.hbm [shape: bf16[32,256], index: 1, kind: input, shape index: {}]   ;;  %s645_s2 = inlined_call_operand.hbm [shape: f32[1,256], index: 2, kind: input, shape index: {}]   ;;  %s646_s3 = inlined_call_operand.hbm [shape: bf16[256,128], index: 3, kind: input, shape index: {}]   ;;  %s647_s4 = inlined_call_operand.vmem [shape: f32[1,128], index: 4, kind: input, shape index: {}]   ;;  %s648_s5 = inlined_call_operand.hbm [shape: f32[16,128], index: 5, kind: output, shape index: {}]  }
   0x1   :  { %11 = vsyncpa [#allocation6], 0 }
   0x2   :  { %12 = vsyncpa [#allocation9], 0 }
   0x3   :  { %13 = vsyncpa [#allocation4], 0  ;;  %s31_s20 = sshll.u32 %s644_s1, 4  ;;  %s577_s21 = smov [#allocation5]   ;;  %s32_s20 = int_to_ptr.hbm [resolvable:$true] %s31_s20 }
   0x4   :  { %s33_s22 = sshll.u32 %s577_s21, 4  ;;  %s18_s25 = sshll.u32 %s643_s0, 4  ;;  %s34_s22 = int_to_ptr.vmem [resolvable:$true] %s33_s22  ;;  %s19_s25 = int_to_ptr.hbm [resolvable:$true] %s18_s25 }
   0x5   :  { %s578_s26 = smov 128   ;;  %s579_s27 = smov 8  }
   0x6   :  { %39 = dma.hbm_to_vmem [thread:$0]  %s32_s20, 512, %s34_s22, [#allocation6], %s578_s26, %s578_s26, %s579_s27  }
   0x7   :  { %s580_s28 = smov [#allocation2]   ;;  %s45_s1 = sshll.u32 %s645_s2, 4  ;;  %s46_s1 = int_to_ptr.hbm [resolvable:$true] %s45_s1 }
   0x8   :  { %s20_s29 = sshll.u32 %s580_s28, 4  ;;  %s55_s8 = sshll.u32 %s646_s3, 4  ;;  %s21_s29 = int_to_ptr.vmem [resolvable:$true] %s20_s29  ;;  %s56_s8 = int_to_ptr.hbm [resolvable:$true] %s55_s8 }
   0x9   :  { %26 = dma.hbm_to_vmem [thread:$0]  %s19_s25, 256, %s21_s29, [#allocation3], %s578_s26, %s578_s26, %s579_s27  }
   0xa   :  { %s581_s9 = smov [#allocation7]   ;;  %s582_s11 = smov [#allocation8]  }
   0xb   :  { %s47_s10 = sshll.u32 %s581_s9, 4  ;;  %s57_s12 = sshll.u32 %s582_s11, 4  ;;  %s48_s10 = int_to_ptr.vmem [resolvable:$true] %s47_s10  ;;  %s58_s12 = int_to_ptr.vmem [resolvable:$true] %s57_s12 }
   0xc   :  { %50 = dma.hbm_to_vmem [thread:$0]  %s46_s1, 32, %s48_s10, [#allocation6]  }
   0xd   :  { %s583_s13 = smov 64   ;;  %s584_s2 = smov 4  }
   0xe   :  { %63 = dma.hbm_to_vmem [thread:$0]  %s56_s8, 2048, %s58_s12, [#allocation9], %s583_s13, %s583_s13, %s584_s2  }
   0xf   :  { %569 = dma.done.wait [#allocation3], 256  }
  0x10   :  { %570 = vsyncadd [#allocation3], 4294967040 }
  0x11   :  { %571 = dma.done.wait [#allocation6], 544  }
  0x12   :  { %572 = vsyncadd [#allocation6], 4294966752 }
  0x13   :  { %573 = dma.done.wait [#allocation9], 2048  }
  0x14   :  { %574 = vsyncadd [#allocation9], 4294965248  ;;  %v347_v0 = vld [vmem:[#allocation5 + $0x10] sm:$0xf]  ;;  %v422_v1 = vld [vmem:[#allocation5 + $0x14] sm:$0xf0] }
  0x15   :  { %v421_v2 = vld [vmem:[#allocation5 + $0x14] sm:$0xf]  ;;  %v348_v3 = vor.u32 %v422_v1, %v347_v0  ;;  %v349_v4 = vld [vmem:[#allocation5 + $0x18] sm:$0xf0]  ;;  %v339_v5 = vld [vmem:[#allocation5] sm:$0xf] }
  0x16   :  { %v420_v6 = vld [vmem:[#allocation5 + $0x4] sm:$0xf0]  ;;  %v352_v7 = vor.u32 %v421_v2, %v349_v4  ;;  %v419_v8 = vld [vmem:[#allocation5 + $0x4] sm:$0xf]  ;;  %v341_v9 = vld [vmem:[#allocation5 + $0x8] sm:$0xf0] }
  0x17   :  { %v83_v10 = vld [vmem:[#allocation2] sm:$0xff]  ;;  %126 = vmatpush.bf16.msra.mxu0 %v348_v3  ;;  %v340_v11 = vor.u32 %v420_v6, %v339_v5  ;;  %v84_v12 = vld [vmem:[#allocation2 + $0x8] sm:$0xff]  ;;  %v344_v15 = vor.u32 %v419_v8, %v341_v9  ;;  %vm116_vm0 = vcmask 261120   ;;  %v427_v21 = vld [vmem:[#allocation8 + $0x20] sm:$0xff]  ;;  %s585_s15 = smov [#allocation10]   ;;  %s322_s19 = sshll.u32 %s648_s5, 4  ;;  %s323_s19 = int_to_ptr.hbm [resolvable:$true] %s322_s19 }
  0x18   :  { %v430_v13 = vld [vmem:[#allocation8 + $0x38] sm:$0xff]  ;;  %140 = vmatpush.bf16.msra.mxu1 %v352_v7  ;;  %v429_v16 = vld [vmem:[#allocation8 + $0x30] sm:$0xff]  ;;  %v85_v18 = vpack.c.bf16 %v84_v12, %v83_v10  ;;  %v428_v19 = vld [vmem:[#allocation8 + $0x28] sm:$0xff]  ;;  %s320_s16 = sshll.u32 %s585_s15, 4  ;;  %s321_s16 = int_to_ptr.vmem [resolvable:$true] %s320_s16 }
  0x19   :  { %v438_v14 = vld [vmem:[#allocation8 + $0x78] sm:$0xff]  ;;  %286 = vmatpush.bf16.msra.mxu2 %v430_v13  ;;  %v437_v17 = vld [vmem:[#allocation8 + $0x70] sm:$0xff]  ;;  %v436_v20 = vld [vmem:[#allocation8 + $0x68] sm:$0xff] }
  0x1a   :  { %300 = vmatpush.bf16.msra.mxu3 %v438_v14  ;;  %v435_v22 = vld [vmem:[#allocation8 + $0x60] sm:$0xff]  ;;  %v426_v23 = vld [vmem:[#allocation8 + $0x18] sm:$0xff]  ;;  %v425_v25 = vld [vmem:[#allocation8 + $0x10] sm:$0xff] }
  0x1b   :  { %127 = vmatpush.bf16.msra.mxu0 %v340_v11  ;;  %v434_v24 = vld [vmem:[#allocation8 + $0x58] sm:$0xff]  ;;  %v433_v26 = vld [vmem:[#allocation8 + $0x50] sm:$0xff]  ;;  %v424_v27 = vld [vmem:[#allocation8 + $0x8] sm:$0xff] }
  0x1c   :  { %141 = vmatpush.bf16.msra.mxu1 %v344_v15  ;;  %v432_v28 = vld [vmem:[#allocation8 + $0x48] sm:$0xff]  ;;  %v423_v29 = vld [vmem:[#allocation8] sm:$0xff]  ;;  %v90_v31 = vld [vmem:[#allocation7] sm:$0x3] }
  0x1d   :  { %287 = vmatpush.bf16.msra.mxu2 %v429_v16  ;;  %v431_v30 = vld [vmem:[#allocation8 + $0x40] sm:$0xff]  ;;  %v92_v34 = vperm.slane %v90_v31, 0  ;;  %v93_v35 = vperm.slane %v90_v31, 1  ;;  %v448_v48 = vld [vmem:[%s647_s4] ss:$0 sm:$0xff] }
  0x1e   :  { %301 = vmatpush.bf16.msra.mxu3 %v437_v17  ;;  %353 = vmatmul.msk.bf16.vlgmr.msra.gmra.mxu0 %vm116_vm0, %v85_v18 }
  0x1f   :  { %354 = vmatmul.msk.bf16.vlgmr.msra.gmra.mxu1 %vm116_vm0, %v85_v18 }
  0x21   :  { %288 = vmatpush.bf16.msra.mxu2 %v428_v19 }
  0x22   :  { %302 = vmatpush.bf16.msra.mxu3 %v436_v20 }
  0x25   :  { %289 = vmatpush.bf16.msra.mxu2 %v427_v21 }
  0x26   :  { %303 = vmatpush.bf16.msra.mxu3 %v435_v22 }
  0x29   :  { %290 = vmatpush.bf16.msra.mxu2 %v426_v23 }
  0x2a   :  { %304 = vmatpush.bf16.msra.mxu3 %v434_v24 }
  0x2d   :  { %291 = vmatpush.bf16.msra.mxu2 %v425_v25 }
  0x2e   :  { %305 = vmatpush.bf16.msra.mxu3 %v433_v26 }
  0x31   :  { %292 = vmatpush.bf16.msra.mxu2 %v424_v27 }
  0x32   :  { %306 = vmatpush.bf16.msra.mxu3 %v432_v28 }
  0x35   :  { %293 = vmatpush.bf16.msra.mxu2 %v423_v29 }
  0x36   :  { %307 = vmatpush.bf16.msra.mxu3 %v431_v30 }
  0x9b   :  { %v129_v32 = vpop.f32.mrf.mxu0 }
  0x9c   :  { %v143_v33 = vpop.f32.mrf.mxu1  ;;  %v130_v36 = vadd.f32 %v129_v32, %v92_v34 }
  0x9d   :  { %v144_v37 = vadd.f32 %v143_v33, %v93_v35 }
  0x9e   :  { %v148_v42 = vmax.f32 %v130_v36, 0.0 }
  0x9f   :  { %v149_v44 = vmax.f32 %v144_v37, 0.0 }
  0xa3   :  { %v131_v38 = vpop.f32.mrf.mxu0 }
  0xa4   :  { %v132_v39 = vadd.f32 %v131_v38, %v92_v34  ;;  %v145_v40 = vpop.f32.mrf.mxu1 }
  0xa5   :  { %v146_v41 = vadd.f32 %v145_v40, %v93_v35 }
  0xa6   :  { %v150_v43 = vmax.f32 %v132_v39, 0.0 }
  0xa7   :  { %v151_v45 = vmax.f32 %v146_v41, 0.0 }
  0xa8   :  { %v152_v46 = vpack.c.bf16 %v150_v43, %v148_v42 }
  0xa9   :  { %v153_v47 = vpack.c.bf16 %v151_v45, %v149_v44 }
  0xaa   :  { %294 = vmatmul.bf16.vlgmr.msra.gmra.mxu2 %v152_v46 }
  0xab   :  { %308 = vmatmul.bf16.vlgmr.msra.gmra.mxu3 %v153_v47 }
 0x12d   :  { %v295_v49 = vpop.f32.mrf.mxu2 }
 0x12e   :  { %v296_v50 = vadd.f32 %v448_v48, %v295_v49  ;;  %v309_v51 = vpop.f32.mrf.mxu3 }
 0x130   :  { %v310_v52 = vadd.f32 %v309_v51, %v296_v50 }
 0x132   :  { %314 = vst [vmem:[#allocation10] sm:$0xff] %v310_v52 }
 0x135   :  { %v297_v53 = vpop.f32.mrf.mxu2 }
 0x136   :  { %v298_v54 = vadd.f32 %v448_v48, %v297_v53  ;;  %v311_v55 = vpop.f32.mrf.mxu3 }
 0x138   :  { %v312_v56 = vadd.f32 %v311_v55, %v298_v54 }
 0x13a   :  { %315 = vst [vmem:[#allocation10 + $0x8] sm:$0xff] %v312_v56 }
 0x13b   :  { %328 = dma.vmem_to_hbm [thread:$0]  %s321_s16, 256, %s323_s19, [#allocation4], %s578_s26, %s578_s26, %s579_s27  }
 0x13c   :  { %575 = dma.done.wait [#allocation4], 256  }
 0x13d   :  { %576 = vsyncadd [#allocation4], 4294967040 }
 0x13e   :  { %333 = vsyncpa [#allocation3], 1 }
 0x13f   :  { %334 = vsyncpa [#allocation6], 1 }
 0x140   :  { %335 = vsyncpa [#allocation9], 1 }
 0x141   :  { %336 = vsyncpa [#allocation4], 1 }

</bundles_post_ra>
